<compile_context>
chip_gen: v6e
topology: v6e:2x2x1
jax: 0.10.0
libtpu: 0.0.40
codegen_flags: <defaults>
</compile_context>

<pallas_src>
import jax
import jax.numpy as jnp
from jax.experimental import pallas as pl
from jax.experimental.pallas import tpu as pltpu

_LANES = 128


def _mish_kernel(x_ref, o_ref):
    x = x_ref[...].astype(jnp.float32)
    # tanh(softplus(x)) = ((1+e^x)^2 - 1) / ((1+e^x)^2 + 1) = u / (u + 2),
    # with u = e^x * (e^x + 2).  Cancellation-free; exp clamped to avoid
    # overflow (for x >= 20, tanh(softplus(x)) == 1 to f32 precision).
    e = jnp.exp(jnp.minimum(x, 20.0))
    u = e * (e + 2.0)
    t = u * pl.reciprocal(u + 2.0, approx=True)
    o_ref[...] = (x * t).astype(o_ref.dtype)


def _round_up(a: int, m: int) -> int:
    return -(-a // m) * m


def _mish_2d(x2d, block_rows):
    rows = x2d.shape[0]  # rows >= 8 guaranteed by caller
    # Large blocks for HBM streaming, but keep ~8 grid steps when the array is
    # big enough (pipeline depth + v7x megacore), and never exceed block_rows
    # (2 MiB f32 block -> <= 8 MiB double-buffered in+out, fits all chips).
    tr = min(block_rows, max(512, _round_up(pl.cdiv(rows, 8), 8)))
    tr = min(tr, (rows // 8) * 8)          # multiple of 8, <= rows
    grid = pl.cdiv(rows, tr)               # partial last block is masked
    return pl.pallas_call(
        _mish_kernel,
        out_shape=jax.ShapeDtypeStruct(x2d.shape, x2d.dtype),
        grid_spec=pl.GridSpec(
            grid=(grid,),
            in_specs=[pl.BlockSpec((tr, _LANES), lambda i: (i, 0))],
            out_specs=pl.BlockSpec((tr, _LANES), lambda i: (i, 0)),
        ),
        compiler_params=pltpu.CompilerParams(
            dimension_semantics=("parallel",),
        ),
    )(x2d)


def _mish_jnp(x):
    xf = x.astype(jnp.float32)
    return (xf * jnp.tanh(jax.nn.softplus(xf))).astype(x.dtype)


def mish(x, *, block_rows=4096):
    """Elementwise Mish via Pallas. Accepts any shape / float dtype."""
    orig_shape = x.shape
    n = x.size
    if n < 8 * _LANES:
        # Tiny tensor: not worth a kernel launch.
        return _mish_jnp(x)

    rows = n // _LANES
    n_main = rows * _LANES
    xf = jnp.ravel(x)

    if n_main == n:
        # Common case: 128-aligned -> zero-copy reshape, no padding, no slicing.
        out = _mish_2d(xf.reshape(rows, _LANES), block_rows).reshape(-1)
    else:
        # Rare non-aligned tail (< 128 elems): kernel on aligned prefix,
        # plain jnp for the remainder (no full-array pad).
        main = _mish_2d(xf[:n_main].reshape(rows, _LANES), block_rows).reshape(-1)
        out = jnp.concatenate([main, _mish_jnp(xf[n_main:])])
    return out.reshape(orig_shape)


if __name__ == "__main__":
    key = jax.random.PRNGKey(0)

    # Small NCHW input consistent with typical conv activations.
    x = jax.random.normal(key, (2, 4, 16, 16), dtype=jnp.float32) * 3.0
    y = jax.block_until_ready(mish(x))
    y_ref = _mish_ref = _mish_jnp(x)
    assert y.shape == x.shape and y.dtype == x.dtype
    assert jnp.allclose(y, y_ref, atol=1e-3, rtol=5e-3), "mismatch vs reference"

    # Awkward size: exercises the partial last block and the non-128 tail path.
    x2 = jax.random.normal(jax.random.PRNGKey(1), (3, 5, 17, 19), dtype=jnp.float32) * 3.0
    y2 = jax.block_until_ready(mish(x2))
    y2_ref = _mish_jnp(x2)
    assert y2.shape == x2.shape and y2.dtype == x2.dtype
    assert jnp.allclose(y2, y2_ref, atol=1e-3, rtol=5e-3), "mismatch vs reference (awkward shape)"

    print("KERNEL_OK")
</pallas_src>

<mosaic_0001>
module attributes {stable_mosaic.version = 11 : i64} {
  func.func @_mish_kernel(%arg0: i32, %arg1: memref<16x128xf32, #tpu.memory_space<vmem>>, %arg2: memref<16x128xf32, #tpu.memory_space<vmem>>) attributes {dimension_semantics = [#tpu.dimension_semantics<parallel>], iteration_bounds = array<i64: 1>, scalar_prefetch = 0 : i64, scratch_operands = 0 : i64, tpu.core_type = #tpu.core_type<tc>, window_params = [{transform_indices = @transform_0, window_bounds = array<i64: 16, 128>}, {transform_indices = @transform_1, window_bounds = array<i64: 16, 128>}]} {
    %c0 = arith.constant 0 : index
    %c0_0 = arith.constant 0 : index
    %0 = vector.load %arg1[%c0, %c0_0] : memref<16x128xf32, #tpu.memory_space<vmem>>, vector<16x128xf32>
    %cst = arith.constant 2.000000e+01 : f32
    %1 = vector.broadcast %cst : f32 to vector<16x128xf32>
    %2 = arith.minimumf %0, %1 : vector<16x128xf32>
    %3 = math.exp %2 : vector<16x128xf32>
    %cst_1 = arith.constant 2.000000e+00 : f32
    %4 = vector.broadcast %cst_1 : f32 to vector<16x128xf32>
    %5 = arith.addf %3, %4 : vector<16x128xf32>
    %6 = arith.mulf %3, %5 : vector<16x128xf32>
    %cst_2 = arith.constant 2.000000e+00 : f32
    %7 = vector.broadcast %cst_2 : f32 to vector<16x128xf32>
    %8 = arith.addf %6, %7 : vector<16x128xf32>
    %9 = tpu.reciprocal %8 {approx = true} : vector<16x128xf32> -> vector<16x128xf32>
    %10 = arith.mulf %6, %9 : vector<16x128xf32>
    %11 = arith.mulf %0, %10 : vector<16x128xf32>
    %c0_3 = arith.constant 0 : index
    %c0_4 = arith.constant 0 : index
    %12 = vector.load %arg2[%c0_3, %c0_4] : memref<16x128xf32, #tpu.memory_space<vmem>>, vector<16x128xf32>
    tpu.vector_store %arg2[%c0_3, %c0_4], %11 {strides = array<i32>} : memref<16x128xf32, #tpu.memory_space<vmem>>, vector<16x128xf32>,
    return
  }
  func.func @transform_0(%arg0: i32) -> (i32, i32) {
    %c0_i32 = arith.constant 0 : i32
    %c0_i32_0 = arith.constant 0 : i32
    return %arg0, %c0_i32 : i32, i32
  }
  func.func @transform_1(%arg0: i32) -> (i32, i32) {
    %c0_i32 = arith.constant 0 : i32
    %c0_i32_0 = arith.constant 0 : i32
    return %arg0, %c0_i32 : i32, i32
  }
}

</mosaic_0001>

<bundles_post_ra>
// kernel: tpu_custom_call.1
= control target key start
LH: loop header
LB: loop body
LE: loop exit
PB: predicated region body
PF: predicated region fallthrough
CT: control target
= control target key end

     0   :  { %6 = vsyncpa [#allocation3], 0  ;;  %s144_s0 = inlined_call_operand.hbm [shape: f32[16,128], index: 0, kind: input, shape index: {}]   ;;  %s145_s1 = inlined_call_operand.hbm [shape: f32[16,128], index: 1, kind: output, shape index: {}]  }
   0x1   :  { %7 = vsyncpa [#allocation4], 0  ;;  %s118_s6 = smov [#allocation2]  }
   0x2   :  { %s13_s7 = sshll.u32 %s118_s6, 4  ;;  %s14_s7 = int_to_ptr.vmem [resolvable:$true] %s13_s7 }
   0x3   :  { %s82_s8 = scalar_lea.vmem %s14_s7, 256  ;;  %p87_p1 = scmp.lt.s32.totalorder %s14_s7, %s14_s7 }
   0x4   :  { %p83_p0 = scmp.ne.s32.totalorder %s14_s7, %s82_s8  ;;  %p88_p2 = scmp.lt.s32.totalorder %s82_s8, %s82_s8 }
   0x6   :  { %p89_p3 = por %p88_p2, %p87_p1 }
   0x8   :  { %p90_p4 = pnand %p89_p3, %p83_p0 }
   0xa   :  { %93 = shalt.err (!%p90_p4)
}
   0xb   :  { %s119_s9 = smov 128   ;;  %s120_s10 = smov 8  }
   0xc   :  { %19 = dma.hbm_to_vmem [thread:$0]  %s144_s0, 256, %s14_s7, [#allocation3], %s119_s9, %s119_s9, %s120_s10  }
   0xd   :  { %114 = dma.done.wait [#allocation3], 256  }
   0xe   :  { %115 = vsyncadd [#allocation3], 4294967040  ;;  %v23_v0 = vld [vmem:[#allocation2] sm:$0xff]  ;;  %v24_v1 = vld [vmem:[#allocation2 + $0x8] sm:$0xff]  ;;  %s121_s0 = smov [#allocation5]  }
   0xf   :  { %v25_v2 = vmin.f32 %v23_v0, 20.0  ;;  %v26_v3 = vmin.f32 %v24_v1, 20.0  ;;  %s50_s13 = sshll.u32 %s121_s0, 4  ;;  %s51_s13 = int_to_ptr.vmem [resolvable:$true] %s50_s13 }
  0x10   :  { %s94_s14 = scalar_lea.vmem %s51_s13, 256  ;;  %p99_p6 = scmp.lt.s32.totalorder %s51_s13, %s51_s13 }
  0x11   :  { %v27_v4 = vmul.f32 1.442695, %v25_v2  ;;  %v29_v5 = vmul.f32 1.442695, %v26_v3  ;;  %p95_p5 = scmp.ne.s32.totalorder %s51_s13, %s94_s14  ;;  %p100_p7 = scmp.lt.s32.totalorder %s94_s14, %s94_s14 }
  0x13   :  { %66 = vpow2.f32 %v27_v4  ;;  %p101_p8 = por %p100_p7, %p99_p6 }
  0x14   :  { %68 = vpow2.f32 %v29_v5 }
  0x15   :  { %p102_p9 = pnand %p101_p8, %p95_p5 }
  0x20   :  { %v67_v6 = vpop.eup %66 }
  0x21   :  { %v69_v7 = vpop.eup %68  ;;  %v31_v8 = vadd.f32 2.0, %v67_v6 }
  0x22   :  { %v32_v9 = vadd.f32 2.0, %v69_v7 }
  0x23   :  { %v33_v10 = vmul.f32 %v67_v6, %v31_v8 }
  0x24   :  { %v34_v11 = vmul.f32 %v69_v7, %v32_v9 }
  0x25   :  { %v35_v12 = vadd.f32 2.0, %v33_v10 }
  0x26   :  { %v36_v13 = vadd.f32 2.0, %v34_v11 }
  0x27   :  { %70 = vrcp.f32 %v35_v12 }
  0x28   :  { %72 = vrcp.f32 %v36_v13 }
  0x34   :  { %v71_v14 = vpop.eup %70 }
  0x35   :  { %v73_v15 = vpop.eup %72  ;;  %v39_v16 = vmul.f32 %v71_v14, %v33_v10 }
  0x36   :  { %v40_v17 = vmul.f32 %v73_v15, %v34_v11 }
  0x37   :  { %v41_v18 = vmul.f32 %v39_v16, %v23_v0 }
  0x38   :  { %v42_v19 = vmul.f32 %v40_v17, %v24_v1 }
  0x39   :  { %43 = vst [vmem:[#allocation5] sm:$0xff] %v41_v18 }
  0x3a   :  { %44 = vst [vmem:[#allocation5 + $0x8] sm:$0xff] %v42_v19 }
  0x3b   :  { %105 = shalt.err (!%p102_p9)
}
  0x3c   :  { %56 = dma.vmem_to_hbm [thread:$0]  %s51_s13, 256, %s145_s1, [#allocation4], %s119_s9, %s119_s9, %s120_s10  }
  0x3d   :  { %116 = dma.done.wait [#allocation4], 256  }
  0x3e   :  { %117 = vsyncadd [#allocation4], 4294967040 }
  0x3f   :  { %60 = vsyncpa [#allocation3], 1 }
  0x40   :  { %61 = vsyncpa [#allocation4], 1 }

</bundles_post_ra>
